<compile_context>
chip_gen: v7x
topology: tpu7x:2x2x1
jax: 0.10.0
libtpu: 0.0.40
codegen_flags: <defaults>
</compile_context>

<pallas_src>
import jax
import jax.numpy as jnp
from jax.experimental import pallas as pl
from jax.experimental.pallas import tpu as pltpu

INPUT_SIZE = 784
HIDDEN = 50
NUM_CLASSES = 10
OUT_PAD = 128              # lane-dense padded output width (unmasked vst)
DEFAULT_TILE_B = 2048      # sweep 2048/4096 (v7x prefers 4096); VMEM limit below covers both
VMEM_LIMIT_BYTES = 48 * 1024 * 1024  # > default scoped limits, < v7x 64 MiB physical


def _round_up(n, m):
    return ((n + m - 1) // m) * m


def mlp_kernel(x_ref, w1_ref, b1_ref, w2_ref, b2_ref, o_ref):
    # fc1: cast the streamed f32 tile to bf16 at the MXU input (VPU op hidden
    # under the x DMA); accumulate in f32.
    x_bf = x_ref[...].astype(jnp.bfloat16)
    h = jnp.dot(x_bf, w1_ref[...], preferred_element_type=jnp.float32)
    h = jnp.maximum(h + b1_ref[...], 0.0)          # b1 is (1, 50), broadcasts
    # fc2 (tiny) in f32; output padded to 128 lanes for unmasked stores.
    out = jnp.dot(h, w2_ref[...], preferred_element_type=jnp.float32)
    o_ref[...] = (out + b2_ref[...]).astype(o_ref.dtype)


def prepare_params(w1, b1, w2, b2):
    """One-time weight preprocessing (hoisted out of the per-call path)."""
    w1_bf = w1.astype(jnp.bfloat16)                                  # MXU operand
    w2_p = jnp.pad(w2, ((0, 0), (0, OUT_PAD - NUM_CLASSES)))         # lane-dense
    b2_p = jnp.pad(b2, ((0, 0), (0, OUT_PAD - NUM_CLASSES)))
    return w1_bf, b1, w2_p, b2_p


def nn_forward(x, params, *, tile_b=DEFAULT_TILE_B):
    """x: (B, 784) float32 -> (B, 10) float32 logits."""
    w1_bf, b1, w2_p, b2_p = params
    B = x.shape[0]

    # Tile size: multiple of 8 (sublane); never larger than needed for B.
    tile_b = max(8, min(tile_b, _round_up(B, 8)))
    grid = (pl.cdiv(B, tile_b),)   # partial last block handled by Pallas

    # Advisory cost hint for XLA's scheduler around the custom call.
    bytes_accessed = (
        B * INPUT_SIZE * 4                 # x read (f32)
        + w1_bf.size * 2 + b1.size * 4     # resident weights/bias
        + w2_p.size * 4 + b2_p.size * 4
        + B * OUT_PAD * 4                  # padded f32 writeback
    )
    cost = pl.CostEstimate(
        flops=2 * B * (INPUT_SIZE * HIDDEN + HIDDEN * OUT_PAD),
        transcendentals=0,
        bytes_accessed=bytes_accessed,
    )

    out_padded = pl.pallas_call(
        mlp_kernel,
        out_shape=jax.ShapeDtypeStruct((B, OUT_PAD), jnp.float32),
        grid_spec=pltpu.PrefetchScalarGridSpec(
            num_scalar_prefetch=0,
            grid=grid,
            in_specs=[
                # x streams tile-by-tile over the batch (double-buffered DMA).
                pl.BlockSpec((tile_b, INPUT_SIZE), lambda i: (i, 0)),
                # Weights/biases: constant block index -> stay VMEM-resident.
                pl.BlockSpec((INPUT_SIZE, HIDDEN), lambda i: (0, 0)),
                pl.BlockSpec((1, HIDDEN), lambda i: (0, 0)),
                pl.BlockSpec((HIDDEN, OUT_PAD), lambda i: (0, 0)),
                pl.BlockSpec((1, OUT_PAD), lambda i: (0, 0)),
            ],
            out_specs=pl.BlockSpec((tile_b, OUT_PAD), lambda i: (i, 0)),
        ),
        compiler_params=pltpu.CompilerParams(
            # Batch tiles are independent: lets v7x split them across its 2 TCs.
            dimension_semantics=("parallel",),
            vmem_limit_bytes=VMEM_LIMIT_BYTES,
        ),
        cost_estimate=cost,
    )(x, w1_bf, b1, w2_p, b2_p)

    return out_padded[:, :NUM_CLASSES]


def init_params(key):
    """Deterministic init mimicking PyTorch nn.Linear (uniform +/- 1/sqrt(fan_in))."""
    k1, k2, k3, k4 = jax.random.split(key, 4)
    bound1 = 1.0 / (INPUT_SIZE ** 0.5)
    bound2 = 1.0 / (HIDDEN ** 0.5)
    # Stored as (in_features, out_features) so the kernel computes x @ W.
    w1 = jax.random.uniform(k1, (INPUT_SIZE, HIDDEN), jnp.float32, -bound1, bound1)
    b1 = jax.random.uniform(k2, (1, HIDDEN), jnp.float32, -bound1, bound1)
    w2 = jax.random.uniform(k3, (HIDDEN, NUM_CLASSES), jnp.float32, -bound2, bound2)
    b2 = jax.random.uniform(k4, (1, NUM_CLASSES), jnp.float32, -bound2, bound2)
    return w1, b1, w2, b2


if __name__ == "__main__":
    key = jax.random.PRNGKey(0)
    kx, kp = jax.random.split(key)

    w1, b1, w2, b2 = init_params(kp)
    params = prepare_params(w1, b1, w2, b2)   # one-time preprocessing

    def ref_bf16(xx):
        # Reference with the same in-kernel bf16 cast (tight tolerance).
        h = jnp.maximum(
            jnp.dot(xx.astype(jnp.bfloat16), w1.astype(jnp.bfloat16),
                    preferred_element_type=jnp.float32) + b1, 0.0)
        return h @ w2 + b2

    # --- main small test ---
    batch = 8
    x = jax.random.normal(kx, (batch, INPUT_SIZE), jnp.float32)
    out = jax.block_until_ready(nn_forward(x, params))
    assert out.shape == (batch, NUM_CLASSES)
    assert jnp.allclose(out, ref_bf16(x), atol=2e-3, rtol=2e-3)

    # Full-f32 reference of the original module (loose tolerance for bf16 cast).
    ref_f32 = jnp.maximum(x @ w1 + b1, 0.0) @ w2 + b2
    assert jnp.allclose(out, ref_f32, atol=5e-2, rtol=5e-2)

    # --- ragged batch test (partial last block, no wrapper-side padding) ---
    batch2 = 13
    x2 = jax.random.normal(kx, (batch2, INPUT_SIZE), jnp.float32)
    out2 = jax.block_until_ready(nn_forward(x2, params))
    assert out2.shape == (batch2, NUM_CLASSES)
    assert jnp.allclose(out2, ref_bf16(x2), atol=2e-3, rtol=2e-3)

    print("KERNEL_OK")
</pallas_src>

<mosaic_0001>
module attributes {stable_mosaic.version = 11 : i64} {
  func.func @mlp_kernel(%arg0: i32, %arg1: memref<8x784xf32, #tpu.memory_space<vmem>>, %arg2: memref<784x50xbf16, #tpu.memory_space<vmem>>, %arg3: memref<1x50xf32, #tpu.memory_space<vmem>>, %arg4: memref<50x128xf32, #tpu.memory_space<vmem>>, %arg5: memref<1x128xf32, #tpu.memory_space<vmem>>, %arg6: memref<8x128xf32, #tpu.memory_space<vmem>>) attributes {dimension_semantics = [#tpu.dimension_semantics<parallel>], iteration_bounds = array<i64: 1>, scalar_prefetch = 0 : i64, scratch_operands = 0 : i64, tpu.core_type = #tpu.core_type<tc>, window_params = [{transform_indices = @transform_0, window_bounds = array<i64: 8, 784>}, {pipeline_mode = #tpu.pipeline_mode<synchronous>, transform_indices = @transform_1, window_bounds = array<i64: 784, 50>}, {pipeline_mode = #tpu.pipeline_mode<synchronous>, transform_indices = @transform_2, window_bounds = array<i64: 1, 50>}, {pipeline_mode = #tpu.pipeline_mode<synchronous>, transform_indices = @transform_3, window_bounds = array<i64: 50, 128>}, {pipeline_mode = #tpu.pipeline_mode<synchronous>, transform_indices = @transform_4, window_bounds = array<i64: 1, 128>}, {transform_indices = @transform_5, window_bounds = array<i64: 8, 128>}]} {
    %c0 = arith.constant 0 : index
    %c0_0 = arith.constant 0 : index
    %0 = vector.load %arg1[%c0, %c0_0] : memref<8x784xf32, #tpu.memory_space<vmem>>, vector<8x784xf32>
    %1 = arith.truncf %0 : vector<8x784xf32> to vector<8x784xbf16>
    %c0_1 = arith.constant 0 : index
    %c0_2 = arith.constant 0 : index
    %2 = vector.load %arg2[%c0_1, %c0_2] : memref<784x50xbf16, #tpu.memory_space<vmem>>, vector<784x50xbf16>
    %cst = arith.constant dense<0.000000e+00> : vector<8x50xf32>
    %3 = tpu.matmul %1, %2, %cst {dimension_numbers = #tpu.dot_dimension_numbers<[1], [0], [0], [1], [0, 0, 1, 1], [], []>} : vector<8x784xbf16>, vector<784x50xbf16>, vector<8x50xf32> -> vector<8x50xf32>
    %c0_3 = arith.constant 0 : index
    %c0_4 = arith.constant 0 : index
    %4 = vector.load %arg3[%c0_3, %c0_4] : memref<1x50xf32, #tpu.memory_space<vmem>>, vector<1x50xf32>
    %5 = vector.broadcast %4 : vector<1x50xf32> to vector<8x50xf32>
    %6 = arith.addf %3, %5 : vector<8x50xf32>
    %cst_5 = arith.constant 0.000000e+00 : f32
    %7 = vector.broadcast %cst_5 : f32 to vector<8x50xf32>
    %8 = arith.maximumf %6, %7 : vector<8x50xf32>
    %c0_6 = arith.constant 0 : index
    %c0_7 = arith.constant 0 : index
    %9 = vector.load %arg4[%c0_6, %c0_7] : memref<50x128xf32, #tpu.memory_space<vmem>>, vector<50x128xf32>
    %cst_8 = arith.constant dense<0.000000e+00> : vector<8x128xf32>
    %10 = tpu.matmul %8, %9, %cst_8 {dimension_numbers = #tpu.dot_dimension_numbers<[1], [0], [0], [1], [0, 0, 1, 1], [], []>} : vector<8x50xf32>, vector<50x128xf32>, vector<8x128xf32> -> vector<8x128xf32>
    %c0_9 = arith.constant 0 : index
    %c0_10 = arith.constant 0 : index
    %11 = vector.load %arg5[%c0_9, %c0_10] : memref<1x128xf32, #tpu.memory_space<vmem>>, vector<1x128xf32>
    %12 = vector.broadcast %11 : vector<1x128xf32> to vector<8x128xf32>
    %13 = arith.addf %10, %12 : vector<8x128xf32>
    %c0_11 = arith.constant 0 : index
    %c0_12 = arith.constant 0 : index
    %14 = vector.load %arg6[%c0_11, %c0_12] : memref<8x128xf32, #tpu.memory_space<vmem>>, vector<8x128xf32>
    tpu.vector_store %arg6[%c0_11, %c0_12], %13 {strides = array<i32>} : memref<8x128xf32, #tpu.memory_space<vmem>>, vector<8x128xf32>,
    return
  }
  func.func @transform_0(%arg0: i32) -> (i32, i32) {
    %c0_i32 = arith.constant 0 : i32
    %c0_i32_0 = arith.constant 0 : i32
    return %arg0, %c0_i32 : i32, i32
  }
  func.func @transform_1(%arg0: i32) -> (i32, i32) {
    %c0_i32 = arith.constant 0 : i32
    %c0_i32_0 = arith.constant 0 : i32
    %c0_i32_1 = arith.constant 0 : i32
    return %c0_i32, %c0_i32_0 : i32, i32
  }
  func.func @transform_2(%arg0: i32) -> (i32, i32) {
    %c0_i32 = arith.constant 0 : i32
    %c0_i32_0 = arith.constant 0 : i32
    %c0_i32_1 = arith.constant 0 : i32
    return %c0_i32, %c0_i32_0 : i32, i32
  }
  func.func @transform_3(%arg0: i32) -> (i32, i32) {
    %c0_i32 = arith.constant 0 : i32
    %c0_i32_0 = arith.constant 0 : i32
    %c0_i32_1 = arith.constant 0 : i32
    return %c0_i32, %c0_i32_0 : i32, i32
  }
  func.func @transform_4(%arg0: i32) -> (i32, i32) {
    %c0_i32 = arith.constant 0 : i32
    %c0_i32_0 = arith.constant 0 : i32
    %c0_i32_1 = arith.constant 0 : i32
    return %c0_i32, %c0_i32_0 : i32, i32
  }
  func.func @transform_5(%arg0: i32) -> (i32, i32) {
    %c0_i32 = arith.constant 0 : i32
    %c0_i32_0 = arith.constant 0 : i32
    return %arg0, %c0_i32 : i32, i32
  }
}

</mosaic_0001>

<bundles_post_ra>
// kernel: tpu_custom_call.1
= control target key start
LH: loop header
LB: loop body
LE: loop exit
PB: predicated region body
PF: predicated region fallthrough
CT: control target
= control target key end

     0   :  { %v946_v44 = vmov 0.0   ;;  %vm947_vm0 = vmmov 0   ;;  %s1189_s0 = inlined_call_operand.vmem [shape: f32[8,784], index: 0, kind: input, shape index: {}]   ;;  %s1190_s1 = inlined_call_operand.vmem [shape: bf16[784,50], index: 1, kind: input, shape index: {}]   ;;  %s1191_s2 = inlined_call_operand.vmem [shape: f32[1,50], index: 2, kind: input, shape index: {}]   ;;  %s1192_s3 = inlined_call_operand.vmem [shape: f32[50,128], index: 3, kind: input, shape index: {}]   ;;  %s1193_s4 = inlined_call_operand.vmem [shape: f32[1,128], index: 4, kind: input, shape index: {}]   ;;  %s1194_s5 = inlined_call_operand.hbm [shape: f32[8,128], index: 5, kind: output, shape index: {}]  }
   0x1   :  { %v873_v0 = vld [vmem:[%s1190_s1 + $0x40] sm:$0xff]   ;;  %v877_v4 = vld [vmem:[%s1190_s1 + $0x48] sm:$0xff]   ;;  %v881_v8 = vld [vmem:[%s1190_s1 + $0x50] sm:$0xff]  }
   0x2   :  { %v874_v1 = vld [vmem:[%s1190_s1] sm:$0xff]   ;;  %761 = vmatprep.subr.bf16.mxu0 %v873_v0  ;;  %v878_v5 = vld [vmem:[%s1190_s1 + $0x8] sm:$0xff]   ;;  %v882_v9 = vld [vmem:[%s1190_s1 + $0x10] sm:$0xff]  }
   0x3   :  { %v875_v2 = vld [vmem:[%s1190_s1 + $0xc0] sm:$0xff]   ;;  %762 = vmatpush3.bf16.msra.mxu0 %v874_v1  ;;  %v879_v6 = vld [vmem:[%s1190_s1 + $0xc8] sm:$0xff]   ;;  %v883_v10 = vld [vmem:[%s1190_s1 + $0xd0] sm:$0xff]  }
   0x4   :  { %v876_v3 = vld [vmem:[%s1190_s1 + $0x80] sm:$0xff]   ;;  %783 = vmatprep.subr.bf16.mxu1 %v875_v2  ;;  %763 = vmatprep.subr.bf16.mxu0 %v877_v4  ;;  %v880_v7 = vld [vmem:[%s1190_s1 + $0x88] sm:$0xff]   ;;  %v884_v11 = vld [vmem:[%s1190_s1 + $0x90] sm:$0xff]  }
   0x5   :  { %784 = vmatpush3.bf16.msra.mxu1 %v876_v3  ;;  %v885_v12 = vld [vmem:[%s1190_s1 + $0x58] sm:$0xff]   ;;  %v889_v16 = vld [vmem:[%s1190_s1 + $0x60] sm:$0xff]   ;;  %v893_v20 = vld [vmem:[%s1190_s1 + $0x68] sm:$0xff]  }
   0x6   :  { %785 = vmatprep.subr.bf16.mxu1 %v879_v6  ;;  %v886_v13 = vld [vmem:[%s1190_s1 + $0x18] sm:$0xff]   ;;  %v890_v17 = vld [vmem:[%s1190_s1 + $0x20] sm:$0xff]   ;;  %v894_v21 = vld [vmem:[%s1190_s1 + $0x28] sm:$0xff]  }
   0x7   :  { %764 = vmatpush3.bf16.msra.mxu0 %v878_v5  ;;  %v887_v14 = vld [vmem:[%s1190_s1 + $0xd8] sm:$0xff]   ;;  %v891_v18 = vld [vmem:[%s1190_s1 + $0xe0] sm:$0xff]   ;;  %v895_v22 = vld [vmem:[%s1190_s1 + $0xe8] sm:$0xff]  }
   0x8   :  { %765 = vmatprep.subr.bf16.mxu0 %v881_v8  ;;  %v888_v15 = vld [vmem:[%s1190_s1 + $0x98] sm:$0xff]   ;;  %v892_v19 = vld [vmem:[%s1190_s1 + $0xa0] sm:$0xff]   ;;  %v896_v23 = vld [vmem:[%s1190_s1 + $0xa8] sm:$0xff]  }
   0x9   :  { %786 = vmatpush3.bf16.msra.mxu1 %v880_v7  ;;  %v897_v24 = vld [vmem:[%s1190_s1 + $0x70] sm:$0xff]   ;;  %v901_v28 = vld [vmem:[%s1190_s1 + $0x78] sm:$0xff]   ;;  %v23_v31 = vld [vmem:[%s1189_s0 + $0x8] sm:$0xff] }
   0xa   :  { %787 = vmatprep.subr.bf16.mxu1 %v883_v10  ;;  %v898_v25 = vld [vmem:[%s1190_s1 + $0x30] sm:$0xff]   ;;  %v902_v29 = vld [vmem:[%s1190_s1 + $0x38] sm:$0xff]   ;;  %v30_v32 = vpack.c.bf16 %v23_v31, %v23_v31  ;;  %v22_v34 = vld [vmem:[%s1189_s0] sm:$0xff] }
   0xb   :  { %766 = vmatpush3.bf16.msra.mxu0 %v882_v9  ;;  %v899_v26 = vld [vmem:[%s1190_s1 + $0xf0] sm:$0xff]   ;;  %v903_v30 = vld [vmem:[%s1190_s1 + $0xf8] sm:$0xff]   ;;  %v29_v35 = vpack.c.bf16 %v22_v34, %v22_v34  ;;  %v905_v36 = vld [vmem:[%s1190_s1 + $0x140] sm:$0xff]  }
   0xc   :  { %767 = vmatprep.subr.bf16.mxu0 %v885_v12  ;;  %v900_v27 = vld [vmem:[%s1190_s1 + $0xb0] sm:$0xff]   ;;  %v904_v33 = vld [vmem:[%s1190_s1 + $0xb8] sm:$0xff]   ;;  %471 = vmatprep.mubr.bf16.mxu0 %v30_v32  ;;  %v906_v39 = vld [vmem:[%s1190_s1 + $0x100] sm:$0xff]  }
   0xd   :  { %788 = vmatpush3.bf16.msra.mxu1 %v884_v11  ;;  %v25_v37 = vld [vmem:[%s1189_s0 + $0x18] sm:$0xff]  ;;  %v24_v40 = vld [vmem:[%s1189_s0 + $0x10] sm:$0xff]  ;;  %v907_v42 = vld [vmem:[%s1190_s1 + $0x148] sm:$0xff]  }
   0xe   :  { %789 = vmatprep.subr.bf16.mxu1 %v887_v14  ;;  %v32_v38 = vpack.c.bf16 %v25_v37, %v25_v37  ;;  %v31_v41 = vpack.c.bf16 %v24_v40, %v24_v40  ;;  %v908_v43 = vld [vmem:[%s1190_s1 + $0x108] sm:$0xff]   ;;  %v909_v45 = vld [vmem:[%s1190_s1 + $0x150] sm:$0xff]   ;;  %v911_v47 = vld [vmem:[%s1190_s1 + $0x158] sm:$0xff]  }
   0xf   :  { %768 = vmatpush3.bf16.msra.mxu0 %v886_v13  ;;  %v910_v46 = vld [vmem:[%s1190_s1 + $0x110] sm:$0xff]   ;;  %v912_v48 = vld [vmem:[%s1190_s1 + $0x118] sm:$0xff]   ;;  %v913_v49 = vld [vmem:[%s1190_s1 + $0x160] sm:$0xff]  }
  0x10   :  { %769 = vmatprep.subr.bf16.mxu0 %v889_v16  ;;  %511 = vmatprep.mubr.bf16.mxu1 %v32_v38  ;;  %v914_v50 = vld [vmem:[%s1190_s1 + $0x120] sm:$0xff]   ;;  %v915_v51 = vld [vmem:[%s1190_s1 + $0x168] sm:$0xff]   ;;  %v28_v55 = vld [vmem:[%s1189_s0 + $0x30] sm:$0xff] }
  0x11   :  { %790 = vmatpush3.bf16.msra.mxu1 %v888_v15  ;;  %v921_v52 = vld [vmem:[%s1190_s1 + $0x180] sm:$0xff]   ;;  %v27_v53 = vld [vmem:[%s1189_s0 + $0x28] sm:$0xff] }
  0x12   :  { %791 = vmatprep.subr.bf16.mxu1 %v891_v18  ;;  %v34_v54 = vpack.c.bf16 %v27_v53, %v27_v53 }
  0x13   :  { %770 = vmatpush3.bf16.msra.mxu0 %v890_v17 }
  0x14   :  { %771 = vmatprep.subr.bf16.mxu0 %v893_v20 }
  0x15   :  { %792 = vmatpush3.bf16.msra.mxu1 %v892_v19 }
  0x16   :  { %793 = vmatprep.subr.bf16.mxu1 %v895_v22 }
  0x17   :  { %772 = vmatpush3.bf16.msra.mxu0 %v894_v21 }
  0x18   :  { %773 = vmatprep.subr.bf16.mxu0 %v897_v24 }
  0x19   :  { %794 = vmatpush3.bf16.msra.mxu1 %v896_v23 }
  0x1a   :  { %795 = vmatprep.subr.bf16.mxu1 %v899_v26 }
  0x1b   :  { %774 = vmatpush3.bf16.msra.mxu0 %v898_v25 }
  0x1c   :  { %775 = vmatprep.subr.bf16.mxu0 %v901_v28 }
  0x1d   :  { %796 = vmatpush3.bf16.msra.mxu1 %v900_v27 }
  0x1e   :  { %797 = vmatprep.subr.bf16.mxu1 %v903_v30 }
  0x1f   :  { %776 = vmatpush3.bf16.msra.mxu0 %v902_v29 }
  0x20   :  { %805 = vmatprep.subr.bf16.mxu0 %v905_v36 }
  0x21   :  { %798 = vmatpush3.bf16.msra.mxu1 %v904_v33 }
  0x22   :  { %472 = vmatmul.mubr.bf16.vlgmr.msra.gmra.mrb[0].mxu0 %v29_v35  ;;  %837 = vmatprep.subr.bf16.mxu1 %v946_v44 }
  0x23   :  { %806 = vmatpush3.bf16.msra.mxu0 %v906_v39 }
  0x24   :  { %512 = vmatmul.mubr.bf16.vlgmr.msra.gmra.mrb[0].mxu1 %v31_v41  ;;  %807 = vmatprep.subr.bf16.mxu0 %v907_v42 }
  0x25   :  { %839 = vmatprep.mubr.msk.bf16.mxu1 %vm947_vm0, %v946_v44 }
  0x27   :  { %808 = vmatpush3.bf16.msra.mxu0 %v908_v43 }
  0x28   :  { %809 = vmatprep.subr.bf16.mxu0 %v909_v45 }
  0x2b   :  { %810 = vmatpush3.bf16.msra.mxu0 %v910_v46 }
  0x2c   :  { %811 = vmatprep.subr.bf16.mxu0 %v911_v47 }
  0x2f   :  { %812 = vmatpush3.bf16.msra.mxu0 %v912_v48 }
  0x30   :  { %813 = vmatprep.subr.bf16.mxu0 %v913_v49 }
  0x31   :  { %10 = vsyncpa [#allocation3], 0  ;;  %v916_v56 = vld [vmem:[%s1190_s1 + $0x128] sm:$0xff]   ;;  %838 = vmatpush3.bf16.msra.mxu1 %v921_v52  ;;  %v35_v57 = vpack.c.bf16 %v28_v55, %v28_v55  ;;  %vm435_vm1 = vcmask 130048   ;;  %v917_v58 = vld [vmem:[%s1190_s1 + $0x170] sm:$0xff]   ;;  %551 = vmatprep.mubr.bf16.mxu0 %v34_v54  ;;  %v948_v2 = vmov 0.0|0.0  }
  0x32   :  { %v918_v59 = vld [vmem:[%s1190_s1 + $0x130] sm:$0xff]   ;;  %v919_v60 = vld [vmem:[%s1190_s1 + $0x178] sm:$0xff]   ;;  %v26_v62 = vld [vmem:[%s1189_s0 + $0x20] sm:$0xff]  ;;  %860 = vmatprep.subr.bf16.mxu1 %v948_v2  ;;  %vm618_vm2 = vcmask 1041408   ;;  %vm614_vm3 = vcmask 408576   ;;  %s949_s19 = smov [#allocation2]  }
  0x33   :  { %814 = vmatpush3.bf16.msra.mxu0 %v914_v50  ;;  %v920_v61 = vld [vmem:[%s1190_s1 + $0x138] sm:$0xff]   ;;  %v33_v63 = vpack.c.bf16 %v26_v62, %v26_v62  ;;  %v600_v0 = vld [vmem:[%s1192_s3] sm:$0xff]  ;;  %v601_v1 = vld [vmem:[%s1192_s3 + $0x8] sm:$0xff]  ;;  %s699_s20 = sshll.u32 %s949_s19, 4  ;;  %s700_s20 = int_to_ptr.vmem [resolvable:$true] %s699_s20 }
  0x34   :  { %815 = vmatprep.subr.bf16.mxu0 %v915_v51  ;;  %840 = vmatmul.mubr.msk.bf16.vlgmr.msra.gmra.mrb[4].mxu1 %vm435_vm1, %v35_v57  ;;  %v861_v3 = vpack.c.bf16 %v601_v1, %v600_v0  ;;  %v602_v4 = vld [vmem:[%s1192_s3 + $0x10] sm:$0xff]  ;;  %v603_v5 = vld [vmem:[%s1192_s3 + $0x18] sm:$0xff]  ;;  %v604_v7 = vld [vmem:[%s1192_s3 + $0x20] sm:$0xff]  ;;  %s922_s21 = scalar_lea.vmem %s700_s20, 128  ;;  %p927_p1 = scmp.lt.s32.totalorder %s700_s20, %s700_s20 }
  0x35   :  { %857 = vmatprep.mubr.msk.f32.mxu1 %vm947_vm0, %v946_v44  ;;  %v864_v6 = vpack.c.bf16 %v603_v5, %v602_v4  ;;  %v605_v8 = vld [vmem:[%s1192_s3 + $0x28] sm:$0xff]  ;;  %v606_v10 = vld [vmem:[%s1192_s3 + $0x30] sm:$0x3]  ;;  %v707_v12 = vld [vmem:[%s1191_s2] ss:$0 sm:$0xff]  ;;  %p923_p0 = scmp.ne.s32.totalorder %s700_s20, %s922_s21  ;;  %p928_p2 = scmp.lt.s32.totalorder %s922_s21, %s922_s21 }
  0x36   :  { %862 = vmatpush3.bf16.msra.mxu1 %v861_v3  ;;  %v867_v9 = vpack.c.bf16 %v605_v8, %v604_v7  ;;  %v758_v36 = vld [vmem:[%s1193_s4] ss:$0 sm:$0xff] }
  0x37   :  { %816 = vmatpush3.bf16.msra.mxu0 %v916_v56  ;;  %863 = vmatprep.subr.bf16.mxu1 %v948_v2  ;;  %p929_p3 = por %p928_p2, %p927_p1 }
  0x38   :  { %817 = vmatprep.subr.bf16.mxu0 %v917_v58 }
  0x39   :  { %p930_p4 = pnand %p929_p3, %p923_p0 }
  0x3a   :  { %865 = vmatpush3.bf16.msra.mxu1 %v864_v6 }
  0x3b   :  { %818 = vmatpush3.bf16.msra.mxu0 %v918_v59  ;;  %866 = vmatprep.subr.bf16.mxu1 %v948_v2 }
  0x3c   :  { %819 = vmatprep.subr.bf16.mxu0 %v919_v60 }
  0x3e   :  { %868 = vmatpush3.bf16.msra.mxu1 %v867_v9 }
  0x3f   :  { %820 = vmatpush3.bf16.msra.mxu0 %v920_v61  ;;  %855 = vmatprep.subr.mxu1 %v946_v44 }
  0x42   :  { %552 = vmatmul.mubr.bf16.vlgmr.msra.gmra.mrb[4].mxu0 %v33_v63  ;;  %856 = vmatpush3.msk.msra.mxu1 %vm618_vm2, %v606_v10 }
  0xf5   :  { %v777_v11 = vpop.f32.mrb[0].mxu0 }
  0xf6   :  { %v778_v13 = vpop.f32.mrb[1].mxu0 }
  0xf7   :  { %v779_v14 = vadd.f32 %v778_v13, %v777_v11  ;;  %v780_v15 = vpop.f32.mrb[2].mxu0  ;;  %v799_v16 = vpop.f32.mrb[0].mxu1 }
  0xf8   :  { %v781_v17 = vpop.f32.mrb[3].mxu0  ;;  %v800_v19 = vpop.f32.mrb[1].mxu1 }
  0xf9   :  { %v474_v18 = vadd.f32 %v779_v14, %v707_v12  ;;  %v801_v20 = vadd.f32 %v800_v19, %v799_v16  ;;  %v802_v21 = vpop.f32.mrb[2].mxu1 }
  0xfa   :  { %v803_v22 = vpop.f32.mrb[3].mxu1 }
  0xfb   :  { %v514_v23 = vadd.f32 %v801_v20, %v474_v18 }
 0x107   :  { %v593_v24 = vpop.f32.mrb[4].mxu1 }
 0x108   :  { %v841_v25 = vpop.f32.mrb[5].mxu1 }
 0x109   :  { %v596_v26 = vpop.f32.mrb[6].mxu1 }
 0x10a   :  { %v842_v27 = vpop.f32.mrb[7].mxu1 }
 0x115   :  { %v821_v28 = vpop.f32.mrb[4].mxu0 }
 0x116   :  { %v822_v29 = vpop.f32.mrb[5].mxu0 }
 0x117   :  { %v823_v30 = vadd.f32 %v822_v29, %v821_v28  ;;  %v824_v31 = vpop.f32.mrb[6].mxu0 }
 0x118   :  { %v825_v32 = vpop.f32.mrb[7].mxu0 }
 0x119   :  { %v554_v33 = vadd.f32 %v823_v30, %v514_v23 }
 0x11b   :  { %v594_v34 = vadd.f32 %v593_v24, %v554_v33 }
 0x11d   :  { %v599_v35 = vmax.f32 %v594_v34, 0.0 }
 0x11f   :  { %858 = vmatmul.mubr.msk.f32.vlgmr.msra.gmra.mrb[8].mxu1 %vm614_vm3, %v599_v35 }
 0x1f2   :  { %v688_v37 = vpop.f32.mrb[8].mxu1 }
 0x1f3   :  { %v689_v38 = vadd.f32 %v758_v36, %v688_v37  ;;  %v859_v39 = vpop.f32.mrb[9].mxu1 }
 0x1f5   :  { %692 = vst [vmem:[#allocation2] sm:$0xff] %v689_v38 }
 0x1f6   :  { %933 = shalt.err (!%p930_p4)
}
 0x1f7   :  { %s934_s24 = scalar_lea.hbm %s1194_s5, 128 }
 0x1f8   :  { %p935_p5 = scmp.ne.s32.totalorder %s1194_s5, %s934_s24  ;;  %p938_p6 = scmp.lt.u32.totalorder %s934_s24, %s1194_s5 }
 0x1fa   :  { %p940_p7 = pnand %p938_p6, %p935_p5 }
 0x1fc   :  { %943 = shalt.err (!%p940_p7)
}
 0x1fd   :  { %702 = dma.vmem_to_hbm [thread:$0]  %s700_s20, 128, %s1194_s5, [#allocation3]  }
 0x1fe   :  { %944 = dma.done.wait [#allocation3], 128  }
 0x1ff   :  { %945 = vsyncadd [#allocation3], 4294967168 }
 0x200   :  { %706 = vsyncpa [#allocation3], 1 }

</bundles_post_ra>
